<compile_context>
chip_gen: v7x
topology: tpu7x:2x2x1
jax: 0.10.0
libtpu: 0.0.40
codegen_flags: <defaults>
</compile_context>

<pallas_src>
import functools

import jax
import jax.numpy as jnp
from jax.experimental import pallas as pl
from jax.experimental.pallas import tpu as pltpu

_EPS = 1e-12  # matches torch.nn.functional.normalize default eps


def _round_up(x, m):
    return (x + m - 1) // m * m


def _arcsin01(x):
    """arcsin on [0, 1] via Abramowitz & Stegun 4.4.46 (|err| <= 2e-8).

    Pure VPU polynomial + one sqrt; avoids relying on a Mosaic arcsin lowering.
    """
    p = jnp.float32(-0.0012624911)
    p = p * x + jnp.float32(0.0066700901)
    p = p * x + jnp.float32(-0.0170881256)
    p = p * x + jnp.float32(0.0308918810)
    p = p * x + jnp.float32(-0.0501743046)
    p = p * x + jnp.float32(0.0889789874)
    p = p * x + jnp.float32(-0.2145988016)
    p = p * x + jnp.float32(1.5707963050)
    return jnp.float32(jnp.pi / 2) - jnp.sqrt(jnp.maximum(1.0 - x, 0.0)) * p


def _prompt_partial_kernel(x_ref, en_ref, inv_xn_ref, out_ref, *,
                           n_valid, m_valid, tile_n):
    """Per-tile partial sum of 2*arcsin(dist/2)^2 over valid (cutout, prompt) pairs."""
    i = pl.program_id(0)
    x = x_ref[...]              # (tn, D)      MXU dtype (f32 or bf16)
    e = en_ref[...]             # (M_pad, D)   MXU dtype, rows pre-normalized
    inv_xn = inv_xn_ref[...]    # (tn, 1)      f32 inverse cutout norms

    # Gram matrix on the MXU: contract over D of both operands (no transpose op).
    g = jax.lax.dot_general(
        x, e, (((1,), (1,)), ((), ())),
        preferred_element_type=jnp.float32)                        # (tn, M_pad)

    cos = g * inv_xn                                               # (tn, M_pad)
    # (dist/2)^2 = (2 - 2*cos)/4; clamp guards rounding (|cos| slightly > 1).
    half2 = jnp.clip(0.5 - 0.5 * cos, 0.0, 1.0)
    half = jnp.sqrt(half2)                                         # dist/2 in [0, 1]
    asin = _arcsin01(half)
    d = 2.0 * asin * asin                                          # 2*arcsin(dist/2)^2

    # Mask out padded cutout rows / padded prompt columns before reducing.
    tn, m_pad = d.shape
    row = jax.lax.broadcasted_iota(jnp.int32, (tn, m_pad), 0) + i * tile_n
    col = jax.lax.broadcasted_iota(jnp.int32, (tn, m_pad), 1)
    d = jnp.where((row < n_valid) & (col < m_valid), d, 0.0)

    # Lane-dense (1, M_pad) partial-sum row; final scalar reduce happens in the
    # fused tail of the jitted forward.
    out_ref[0] = jnp.sum(d, axis=0, keepdims=True)


@functools.partial(jax.jit, static_argnames=("num_prompts", "block_n"))
def _prompt_forward_impl(x, embed_normed, weight, *, num_prompts, block_n):
    x = jnp.asarray(x, jnp.float32)
    N, D = x.shape
    M_pad, D2 = embed_normed.shape
    assert D == D2, (x.shape, embed_normed.shape)
    mxu_dtype = embed_normed.dtype

    # Sublane rounding: bf16 packs 16 rows per vreg, f32 packs 8.
    sublane = 16 if mxu_dtype == jnp.bfloat16 else 8
    tn = min(_round_up(block_n, sublane), _round_up(N, sublane))
    N_pad = _round_up(N, tn)
    grid_n = N_pad // tn

    x_p = jnp.pad(x, ((0, N_pad - N), (0, 0)))
    # f32 inverse row norms computed BEFORE the MXU-dtype cast (fused by XLA);
    # clamp on sumsq at eps^2 == clamp on the norm at eps (torch normalize).
    sumsq = jnp.sum(x_p * x_p, axis=1, keepdims=True)
    inv_xn = jax.lax.rsqrt(jnp.maximum(sumsq, _EPS * _EPS))        # (N_pad, 1) f32
    x_in = x_p.astype(mxu_dtype)

    kernel = functools.partial(
        _prompt_partial_kernel, n_valid=N, m_valid=num_prompts, tile_n=tn)

    flops = 2 * N_pad * M_pad * D + 24 * N_pad * M_pad
    bytes_accessed = (x_in.size * x_in.dtype.itemsize
                      + embed_normed.size * embed_normed.dtype.itemsize
                      + N_pad * 4 + grid_n * M_pad * 4)

    partial = pl.pallas_call(
        kernel,
        out_shape=jax.ShapeDtypeStruct((grid_n, 1, M_pad), jnp.float32),
        grid=(grid_n,),
        in_specs=[
            pl.BlockSpec((tn, D), lambda i: (i, 0)),         # cutout tile (pipelined)
            pl.BlockSpec((M_pad, D), lambda i: (0, 0)),      # normalized prompts (resident)
            pl.BlockSpec((tn, 1), lambda i: (i, 0)),         # f32 inverse cutout norms
        ],
        out_specs=pl.BlockSpec((1, 1, M_pad), lambda i: (i, 0, 0)),
        compiler_params=pltpu.CompilerParams(
            dimension_semantics=("parallel",)),              # megacore-shard N on v7x
        cost_estimate=pl.CostEstimate(
            flops=flops,
            transcendentals=2 * N_pad * M_pad + N_pad,       # 2 sqrt / elem + row rsqrt
            bytes_accessed=bytes_accessed),
    )(x_in, embed_normed, inv_xn)

    mean_d = jnp.sum(partial) / (N * num_prompts)
    # ReplaceGrad.forward(dists, maximum(dists, stop)) returns dists unchanged in
    # the forward pass; `stop` only matters for the custom backward.
    # TODO(synk): ReplaceGrad custom backward (and arcsin'(1)=inf at the clip
    # boundary) is not part of this forward-only kernel.
    return jnp.abs(weight) * (jnp.sign(weight) * mean_d)


def make_prompt(embed, weight=1.0, stop=float("-inf"), *, mxu_dtype=jnp.bfloat16):
    """One-time setup mirroring Prompt.__init__.

    `embed` is a constant registered buffer, so it is L2-normalized, zero-padded
    to a lane-dense multiple of 128 prompts and cast to the MXU dtype ONCE here,
    off the per-call hot path.  bf16 is the recommended MXU dtype on all of
    v5e / v6e / v7x (f32 accumulation; the kernel is DMA/overhead bound).
    """
    embed = jnp.asarray(embed, jnp.float32)
    M, D = embed.shape
    M_pad = _round_up(max(M, 1), 128)
    inv_en = jax.lax.rsqrt(
        jnp.maximum(jnp.sum(embed * embed, axis=1, keepdims=True), _EPS * _EPS))
    en = jnp.pad(embed * inv_en, ((0, M_pad - M), (0, 0))).astype(mxu_dtype)
    return {
        "embed_normed": en,          # (M_pad, D), rows pre-normalized, pad rows = 0
        "num_prompts": M,            # static
        "weight": jnp.float32(weight),
        "stop": jnp.float32(stop),   # unused in forward (ReplaceGrad is identity)
    }


def prompt_forward(params, x, *, block_n=256):
    """Forward pass of Prompt(embed, weight, stop)(x) as one fused jit executable."""
    return _prompt_forward_impl(
        x, params["embed_normed"], params["weight"],
        num_prompts=params["num_prompts"], block_n=block_n)


def prompt_forward_ref(x, embed, weight, stop):
    """Pure-JAX reference mirroring the PyTorch module."""
    del stop
    xn = x / jnp.maximum(jnp.linalg.norm(x, axis=1, keepdims=True), _EPS)
    en = embed / jnp.maximum(jnp.linalg.norm(embed, axis=1, keepdims=True), _EPS)
    dists = jnp.linalg.norm(xn[:, None, :] - en[None, :, :], axis=2)
    d = jnp.arcsin(dists / 2.0) ** 2 * 2.0 * jnp.sign(weight)
    return jnp.abs(weight) * jnp.mean(d)


if __name__ == "__main__":
    key = jax.random.PRNGKey(0)
    kx, ke = jax.random.split(key)

    # Small shapes consistent with the module: N cutout embeddings vs M prompts.
    N, M, D = 8, 2, 32
    x = jax.random.normal(kx, (N, D), dtype=jnp.float32)       # "input"
    embed = jax.random.normal(ke, (M, D), dtype=jnp.float32)   # buffer "embed"
    weight = 0.5                                               # buffer "weight"
    stop = float("-inf")                                       # buffer "stop"

    ref = prompt_forward_ref(x, embed, jnp.float32(weight), jnp.float32(stop))

    # f32 MXU-input path: tight agreement with the f32 reference.
    params_f32 = make_prompt(embed, weight, stop, mxu_dtype=jnp.float32)
    out = jax.block_until_ready(prompt_forward(params_f32, x))
    assert out.shape == () and out.dtype == jnp.float32
    assert jnp.allclose(out, ref, atol=1e-4, rtol=1e-4), (out, ref)

    # bf16 MXU-input path (recommended default on v5e/v6e/v7x): f32 accumulation
    # + f32 wrapper-side norms, so only the Gram inputs are bf16-rounded.
    params_bf16 = make_prompt(embed, weight, stop, mxu_dtype=jnp.bfloat16)
    out_bf16 = jax.block_until_ready(prompt_forward(params_bf16, x))
    assert jnp.allclose(out_bf16, ref, atol=2e-2, rtol=2e-2), (out_bf16, ref)

    # Negative weight exercises the sign/abs path.
    params_neg = make_prompt(embed, -1.5, stop, mxu_dtype=jnp.float32)
    ref_neg = prompt_forward_ref(x, embed, jnp.float32(-1.5), jnp.float32(stop))
    out_neg = jax.block_until_ready(prompt_forward(params_neg, x))
    assert jnp.allclose(out_neg, ref_neg, atol=1e-4, rtol=1e-4), (out_neg, ref_neg)

    print("KERNEL_OK")
</pallas_src>

<mosaic_0001>
module attributes {stable_mosaic.version = 11 : i64} {
  func.func @_prompt_partial_kernel(%arg0: i32, %arg1: memref<8x32xf32, #tpu.memory_space<vmem>>, %arg2: memref<128x32xf32, #tpu.memory_space<vmem>>, %arg3: memref<8x1xf32, #tpu.memory_space<vmem>>, %arg4: memref<1x1x128xf32, #tpu.memory_space<vmem>>) attributes {dimension_semantics = [#tpu.dimension_semantics<parallel>], iteration_bounds = array<i64: 1>, scalar_prefetch = 0 : i64, scratch_operands = 0 : i64, tpu.core_type = #tpu.core_type<tc>, window_params = [{transform_indices = @transform_0, window_bounds = array<i64: 8, 32>}, {pipeline_mode = #tpu.pipeline_mode<synchronous>, transform_indices = @transform_1, window_bounds = array<i64: 128, 32>}, {transform_indices = @transform_2, window_bounds = array<i64: 8, 1>}, {transform_indices = @transform_3, window_bounds = array<i64: 1, 1, 128>}]} {
    %c0 = arith.constant 0 : index
    %c0_0 = arith.constant 0 : index
    %0 = vector.load %arg1[%c0, %c0_0] : memref<8x32xf32, #tpu.memory_space<vmem>>, vector<8x32xf32>
    %c0_1 = arith.constant 0 : index
    %c0_2 = arith.constant 0 : index
    %1 = vector.load %arg2[%c0_1, %c0_2] : memref<128x32xf32, #tpu.memory_space<vmem>>, vector<128x32xf32>
    %c0_3 = arith.constant 0 : index
    %c0_4 = arith.constant 0 : index
    %2 = vector.load %arg3[%c0_3, %c0_4] : memref<8x1xf32, #tpu.memory_space<vmem>>, vector<8x1xf32>
    %cst = arith.constant dense<0.000000e+00> : vector<8x128xf32>
    %3 = tpu.matmul %0, %1, %cst {dimension_numbers = #tpu.dot_dimension_numbers<[1], [1], [0], [0], [0, 0, 1, 0], [], []>} : vector<8x32xf32>, vector<128x32xf32>, vector<8x128xf32> -> vector<8x128xf32>
    %4 = vector.broadcast %2 : vector<8x1xf32> to vector<8x128xf32>
    %5 = arith.mulf %3, %4 : vector<8x128xf32>
    %cst_5 = arith.constant 5.000000e-01 : f32
    %6 = vector.broadcast %cst_5 : f32 to vector<8x128xf32>
    %7 = arith.mulf %6, %5 : vector<8x128xf32>
    %cst_6 = arith.constant 5.000000e-01 : f32
    %8 = vector.broadcast %cst_6 : f32 to vector<8x128xf32>
    %9 = arith.subf %8, %7 : vector<8x128xf32>
    %cst_7 = arith.constant 0.000000e+00 : f32
    %cst_8 = arith.constant 1.000000e+00 : f32
    %10 = vector.broadcast %cst_7 : f32 to vector<8x128xf32>
    %11 = arith.maximumf %10, %9 : vector<8x128xf32>
    %12 = vector.broadcast %cst_8 : f32 to vector<8x128xf32>
    %13 = arith.minimumf %12, %11 : vector<8x128xf32>
    %14 = math.sqrt %13 : vector<8x128xf32>
    %cst_9 = arith.constant -0.0012624911 : f32
    %15 = vector.broadcast %cst_9 : f32 to vector<8x128xf32>
    %16 = arith.mulf %15, %14 : vector<8x128xf32>
    %cst_10 = arith.constant 6.670090e-03 : f32
    %17 = vector.broadcast %cst_10 : f32 to vector<8x128xf32>
    %18 = arith.addf %16, %17 : vector<8x128xf32>
    %19 = arith.mulf %18, %14 : vector<8x128xf32>
    %cst_11 = arith.constant -0.0170881264 : f32
    %20 = vector.broadcast %cst_11 : f32 to vector<8x128xf32>
    %21 = arith.addf %19, %20 : vector<8x128xf32>
    %22 = arith.mulf %21, %14 : vector<8x128xf32>
    %cst_12 = arith.constant 0.0308918804 : f32
    %23 = vector.broadcast %cst_12 : f32 to vector<8x128xf32>
    %24 = arith.addf %22, %23 : vector<8x128xf32>
    %25 = arith.mulf %24, %14 : vector<8x128xf32>
    %cst_13 = arith.constant -0.0501743034 : f32
    %26 = vector.broadcast %cst_13 : f32 to vector<8x128xf32>
    %27 = arith.addf %25, %26 : vector<8x128xf32>
    %28 = arith.mulf %27, %14 : vector<8x128xf32>
    %cst_14 = arith.constant 0.0889789909 : f32
    %29 = vector.broadcast %cst_14 : f32 to vector<8x128xf32>
    %30 = arith.addf %28, %29 : vector<8x128xf32>
    %31 = arith.mulf %30, %14 : vector<8x128xf32>
    %cst_15 = arith.constant -0.214598805 : f32
    %32 = vector.broadcast %cst_15 : f32 to vector<8x128xf32>
    %33 = arith.addf %31, %32 : vector<8x128xf32>
    %34 = arith.mulf %33, %14 : vector<8x128xf32>
    %cst_16 = arith.constant 1.57079625 : f32
    %35 = vector.broadcast %cst_16 : f32 to vector<8x128xf32>
    %36 = arith.addf %34, %35 : vector<8x128xf32>
    %cst_17 = arith.constant 1.000000e+00 : f32
    %37 = vector.broadcast %cst_17 : f32 to vector<8x128xf32>
    %38 = arith.subf %37, %14 : vector<8x128xf32>
    %cst_18 = arith.constant 0.000000e+00 : f32
    %39 = vector.broadcast %cst_18 : f32 to vector<8x128xf32>
    %40 = arith.maximumf %38, %39 : vector<8x128xf32>
    %41 = math.sqrt %40 : vector<8x128xf32>
    %42 = arith.mulf %41, %36 : vector<8x128xf32>
    %cst_19 = arith.constant 1.57079637 : f32
    %43 = vector.broadcast %cst_19 : f32 to vector<8x128xf32>
    %44 = arith.subf %43, %42 : vector<8x128xf32>
    %cst_20 = arith.constant 2.000000e+00 : f32
    %45 = vector.broadcast %cst_20 : f32 to vector<8x128xf32>
    %46 = arith.mulf %45, %44 : vector<8x128xf32>
    %47 = arith.mulf %46, %44 : vector<8x128xf32>
    %48 = tpu.iota {dimensions = array<i32: 0>} : vector<8x128xi32>
    %c8_i32 = arith.constant 8 : i32
    %49 = arith.muli %arg0, %c8_i32 : i32
    %50 = vector.broadcast %49 : i32 to vector<8x128xi32>
    %51 = arith.addi %48, %50 : vector<8x128xi32>
    %52 = tpu.iota {dimensions = array<i32: 1>} : vector<8x128xi32>
    %c8_i32_21 = arith.constant 8 : i32
    %53 = vector.broadcast %c8_i32_21 : i32 to vector<8x128xi32>
    %54 = arith.cmpi slt, %51, %53 : vector<8x128xi32>
    %c2_i32 = arith.constant 2 : i32
    %55 = vector.broadcast %c2_i32 : i32 to vector<8x128xi32>
    %56 = arith.cmpi slt, %52, %55 : vector<8x128xi32>
    %57 = arith.andi %54, %56 : vector<8x128xi1>
    %cst_22 = arith.constant 0.000000e+00 : f32
    %58 = vector.broadcast %cst_22 : f32 to vector<8x128xf32>
    %59 = arith.select %57, %47, %58 : vector<8x128xi1>, vector<8x128xf32>
    %cst_23 = arith.constant dense<0.000000e+00> : vector<128xf32>
    %60 = vector.multi_reduction <add>, %59, %cst_23 [0] : vector<8x128xf32> to vector<128xf32>
    %61 = vector.shape_cast %60 : vector<128xf32> to vector<1x128xf32>
    %c0_24 = arith.constant 0 : index
    %c0_25 = arith.constant 0 : index
    %c0_26 = arith.constant 0 : index
    %62 = vector.load %arg4[%c0_24, %c0_25, %c0_26] : memref<1x1x128xf32, #tpu.memory_space<vmem>>, vector<1x1x128xf32>
    %63 = vector.shape_cast %62 : vector<1x1x128xf32> to vector<1x128xf32>
    %64 = vector.shape_cast %61 : vector<1x128xf32> to vector<1x1x128xf32>
    tpu.vector_store %arg4[%c0_24, %c0_25, %c0_26], %64 {strides = array<i32>} : memref<1x1x128xf32, #tpu.memory_space<vmem>>, vector<1x1x128xf32>,
    return
  }
  func.func @transform_0(%arg0: i32) -> (i32, i32) {
    %c0_i32 = arith.constant 0 : i32
    %c0_i32_0 = arith.constant 0 : i32
    return %arg0, %c0_i32 : i32, i32
  }
  func.func @transform_1(%arg0: i32) -> (i32, i32) {
    %c0_i32 = arith.constant 0 : i32
    %c0_i32_0 = arith.constant 0 : i32
    %c0_i32_1 = arith.constant 0 : i32
    return %c0_i32, %c0_i32_0 : i32, i32
  }
  func.func @transform_2(%arg0: i32) -> (i32, i32) {
    %c0_i32 = arith.constant 0 : i32
    %c0_i32_0 = arith.constant 0 : i32
    return %arg0, %c0_i32 : i32, i32
  }
  func.func @transform_3(%arg0: i32) -> (i32, i32, i32) {
    %c0_i32 = arith.constant 0 : i32
    %c0_i32_0 = arith.constant 0 : i32
    %c0_i32_1 = arith.constant 0 : i32
    return %arg0, %c0_i32, %c0_i32_0 : i32, i32, i32
  }
}

</mosaic_0001>

<bundles_post_ra>
// kernel: _prompt_forward_impl.1
= control target key start
LH: loop header
LB: loop body
LE: loop exit
PB: predicated region body
PF: predicated region fallthrough
CT: control target
= control target key end

     0   :  { %vm32_vm0 = vcmask 261120   ;;  %v330_v0 = vmov 0.0|0.0   ;;  %vm331_vm2 = vmmov 0   ;;  %v332_v4 = vmov 0.0   ;;  %s434_s1 = inlined_call_operand.vmem [shape: f32[128,32], index: 1, kind: input, shape index: {}]   ;;  %s435_s2 = inlined_call_operand.vmem [shape: f32[8,1], index: 2, kind: input, shape index: {}]   ;;  %s436_s0 = inlined_call_operand.vmem [shape: f32[8,32], index: 0, kind: input, shape index: {}]   ;;  %s437_s3 = inlined_call_operand.vmem [shape: f32[1,1,128], index: 3, kind: output, shape index: {}]  }
   0x1   :  { %289 = vmatprep.subr.bf16.mxu0 %v330_v0  ;;  %v15_v1 = vld [vmem:[%s434_s1] sm:$0xff]  ;;  %v16_v2 = vld [vmem:[%s434_s1 + $0x8] sm:$0xff]  ;;  %vm362_vm1 = vmpackc.low %vm32_vm0, %vm32_vm0  ;;  %286 = vmatprep.mubr.msk.f32.mxu0 %vm331_vm2, %v332_v4  ;;  %v333_v6 = vmov 0   ;;  %v203_v62 = vlaneseq }
   0x2   :  { %v290_v5 = vpack.c.bf16 %v16_v2, %v15_v1  ;;  %325 = vset.pattern.permute.xlu0 %v333_v6  ;;  %v17_v7 = vld [vmem:[%s434_s1 + $0x10] sm:$0xff]  ;;  %v18_v8 = vld [vmem:[%s434_s1 + $0x18] sm:$0xff]  ;;  %v31_v9 = vld [vmem:[%s435_s2] sm:$0xff] }
   0x3   :  { %v294_v10 = vpack.c.bf16 %v18_v8, %v17_v7  ;;  %156 = vperm.xlu0 %325, %v31_v9   ;;  %v19_v11 = vld [vmem:[%s434_s1 + $0x20] sm:$0xff]  ;;  %v20_v12 = vld [vmem:[%s434_s1 + $0x28] sm:$0xff]  ;;  %v21_v14 = vld [vmem:[%s434_s1 + $0x30] sm:$0xff]  ;;  %v204_v2 = vand.u32 127, %v203_v62 }
   0x4   :  { %292 = vmatpush3.bf16.xpose.msk.msra.mxu0 %vm362_vm1, %v290_v5  ;;  %v298_v13 = vpack.c.bf16 %v20_v12, %v19_v11  ;;  %v22_v15 = vld [vmem:[%s434_s1 + $0x38] sm:$0xff]  ;;  %v23_v17 = vld [vmem:[%s434_s1 + $0x40] sm:$0xff]  ;;  %v24_v18 = vld [vmem:[%s434_s1 + $0x48] sm:$0xff] }
   0x5   :  { %293 = vmatprep.subr.bf16.mxu0 %v330_v0  ;;  %v302_v16 = vpack.c.bf16 %v22_v15, %v21_v14  ;;  %v306_v19 = vpack.c.bf16 %v24_v18, %v23_v17  ;;  %v25_v20 = vld [vmem:[%s434_s1 + $0x50] sm:$0xff]  ;;  %v26_v21 = vld [vmem:[%s434_s1 + $0x58] sm:$0xff]  ;;  %v27_v23 = vld [vmem:[%s434_s1 + $0x60] sm:$0xff]  ;;  %vm206_vm7 = vcmp.lt.s32.totalorder %v204_v2, 2 }
   0x6   :  { %v310_v22 = vpack.c.bf16 %v26_v21, %v25_v20  ;;  %v28_v24 = vld [vmem:[%s434_s1 + $0x68] sm:$0xff]  ;;  %v29_v26 = vld [vmem:[%s434_s1 + $0x70] sm:$0xff]  ;;  %v30_v27 = vld [vmem:[%s434_s1 + $0x78] sm:$0xff] }
   0x7   :  { %v314_v25 = vpack.c.bf16 %v28_v24, %v27_v23  ;;  %v318_v28 = vpack.c.bf16 %v30_v27, %v29_v26  ;;  %v14_v29 = vld [vmem:[%s436_s0] sm:$0xff] }
   0xc   :  { %296 = vmatpush3.bf16.xpose.msk.msra.mxu0 %vm362_vm1, %v294_v10 }
   0xd   :  { %297 = vmatprep.subr.bf16.mxu0 %v330_v0 }
  0x14   :  { %300 = vmatpush3.bf16.xpose.msk.msra.mxu0 %vm362_vm1, %v298_v13 }
  0x15   :  { %301 = vmatprep.subr.bf16.mxu0 %v330_v0 }
  0x1c   :  { %304 = vmatpush3.bf16.xpose.msk.msra.mxu0 %vm362_vm1, %v302_v16 }
  0x1d   :  { %305 = vmatprep.subr.bf16.mxu0 %v330_v0 }
  0x24   :  { %308 = vmatpush3.bf16.xpose.msk.msra.mxu0 %vm362_vm1, %v306_v19 }
  0x25   :  { %309 = vmatprep.subr.bf16.mxu0 %v330_v0 }
  0x2c   :  { %312 = vmatpush3.bf16.xpose.msk.msra.mxu0 %vm362_vm1, %v310_v22 }
  0x2d   :  { %313 = vmatprep.subr.bf16.mxu0 %v330_v0 }
  0x34   :  { %316 = vmatpush3.bf16.xpose.msk.msra.mxu0 %vm362_vm1, %v314_v25 }
  0x35   :  { %317 = vmatprep.subr.bf16.mxu0 %v330_v0 }
  0x3c   :  { %320 = vmatpush3.bf16.xpose.msk.msra.mxu0 %vm362_vm1, %v318_v28 }
  0x43   :  { %287 = vmatmul.mubr.msk.f32.vlgmr.msra.gmra.mrb[0].mxu0 %vm32_vm0, %v14_v29 }
  0x82   :  { %v157_v30 = vpop.permute.xlu0 %156 }
 0x116   :  { %v150_v31 = vpop.f32.mrb[0].mxu0 }
 0x117   :  { %v159_v32 = vmul.f32 %v157_v30, %v150_v31  ;;  %v288_v33 = vpop.f32.mrb[1].mxu0 }
 0x119   :  { %v160_v34 = vmul.f32 0.5, %v159_v32 }
 0x11b   :  { %v161_v35 = vsub.f32 0.5, %v160_v34 }
 0x11d   :  { %v162_v36 = vmax.f32 %v161_v35, 0.0 }
 0x11f   :  { %v163_v37 = vmin.f32 %v162_v36, 1.0 }
 0x121   :  { %326 = vrsqrt.f32 %v163_v37  ;;  %vm166_vm3 = vcmp.eq.f32.partialorder %v163_v37, inf  ;;  %v169_v40 = vand.u32 2147483648, %v163_v37  ;;  %vm168_vm4 = vcmp.eq.f32.partialorder %v163_v37, 0.0 }
 0x12b   :  { %v327_v38 = vpop.eup %326 }
 0x12c   :  { %v165_v39 = vmul.f32 %v327_v38, %v163_v37 }
 0x12e   :  { %v167_v41 = vsel %vm166_vm3, %v163_v37, %v165_v39 }
 0x12f   :  { %v170_v42 = vsel %vm168_vm4, %v169_v40, %v167_v41 }
 0x130   :  { %v171_v43 = vmul.f32 -0.0012624911, %v170_v42  ;;  %v185_v44 = vsub.f32 1.0, %v170_v42 }
 0x132   :  { %v172_v45 = vadd.f32 0.00667009, %v171_v43  ;;  %v186_v46 = vmax.f32 %v185_v44, 0.0 }
 0x134   :  { %v173_v47 = vmul.f32 %v172_v45, %v170_v42  ;;  %328 = vrsqrt.f32 %v186_v46  ;;  %vm189_vm5 = vcmp.eq.f32.partialorder %v186_v46, inf  ;;  %v192_v61 = vand.u32 2147483648, %v186_v46 }
 0x135   :  { %vm191_vm6 = vcmp.eq.f32.partialorder %v186_v46, 0.0 }
 0x136   :  { %v174_v48 = vadd.f32 -0.017088126, %v173_v47 }
 0x138   :  { %v175_v49 = vmul.f32 %v174_v48, %v170_v42 }
 0x13a   :  { %v176_v50 = vadd.f32 0.03089188, %v175_v49 }
 0x13c   :  { %v177_v51 = vmul.f32 %v176_v50, %v170_v42 }
 0x13e   :  { %v178_v52 = vadd.f32 -0.050174303, %v177_v51  ;;  %v329_v54 = vpop.eup %328 }
 0x13f   :  { %v188_v57 = vmul.f32 %v329_v54, %v186_v46 }
 0x140   :  { %v179_v53 = vmul.f32 %v178_v52, %v170_v42 }
 0x141   :  { %v190_v60 = vsel %vm189_vm5, %v186_v46, %v188_v57 }
 0x142   :  { %v180_v55 = vadd.f32 0.08897899, %v179_v53  ;;  %v193_v0 = vsel %vm191_vm6, %v192_v61, %v190_v60 }
 0x144   :  { %v181_v56 = vmul.f32 %v180_v55, %v170_v42 }
 0x146   :  { %v182_v58 = vadd.f32 -0.2145988, %v181_v56 }
 0x148   :  { %v183_v59 = vmul.f32 %v182_v58, %v170_v42 }
 0x14a   :  { %v184_v63 = vadd.f32 1.5707963, %v183_v59 }
 0x14c   :  { %v194_v1 = vmul.f32 %v193_v0, %v184_v63 }
 0x14e   :  { %v195_v3 = vsub.f32 1.5707964, %v194_v1 }
 0x150   :  { %v196_v4 = vmul.f32 2.0, %v195_v3 }
 0x152   :  { %v197_v5 = vmul.f32 %v196_v4, %v195_v3 }
 0x154   :  { %v208_v6 = vsel %vm206_vm7, %v197_v5, 0.0 }
 0x155   :  { %v209_v7 = vrot.slane %v208_v6, 4 }
 0x157   :  { %v210_v8 = vadd.f32 %v209_v7, %v208_v6 }
 0x159   :  { %v211_v9 = vrot.slane %v210_v8, 2 }
 0x15b   :  { %v212_v10 = vadd.f32 %v211_v9, %v210_v8 }
 0x15d   :  { %v213_v11 = vrot.slane %v212_v10, 1 }
 0x15f   :  { %v214_v12 = vadd.f32 %v213_v11, %v212_v10 }
 0x161   :  { %215 = vst [vmem:[%s437_s3] sm:$0x1] %v214_v12 }

</bundles_post_ra>
